<compile_context>
chip_gen: v6e
topology: v6e:2x2x1
jax: 0.10.0
libtpu: 0.0.40
codegen_flags: <defaults>
</compile_context>

<pallas_src>
import functools

import jax
import jax.numpy as jnp
from jax.experimental import pallas as pl
from jax.experimental.pallas import tpu as pltpu


def _rmsnorm_kernel(x_ref, w_ref, o_ref, *, eps, inv_dim):
    # x_ref: (tm, dim_p) tile, w_ref: (1, dim_p) resident, o_ref: (tm, dim_p)
    x32 = x_ref[...].astype(jnp.float32)
    # Padded lanes are zero, so the sum equals the sum over the real dim.
    ms = jnp.sum(x32 * x32, axis=-1, keepdims=True) * inv_dim        # (tm, 1)
    # Reproduce torch: a / rsqrt(ms + eps) == a * sqrt(ms + eps)
    normed = (x32 * jnp.sqrt(ms + eps)).astype(x_ref.dtype)          # .type_as(a)
    o_ref[...] = normed.astype(o_ref.dtype) * w_ref[...]             # weight already out_dtype


def rmsnorm(x, weight, norm_eps):
    """x: (..., dim), weight: (dim,). Same semantics as the torch module."""
    orig_shape = x.shape
    dim = orig_shape[-1]
    rows = 1
    for s in orig_shape[:-1]:
        rows *= s
    x2 = x.reshape(rows, dim)

    out_dtype = jnp.promote_types(x.dtype, weight.dtype)   # out * weight promotion

    in_bytes = jnp.dtype(x.dtype).itemsize
    out_bytes = jnp.dtype(out_dtype).itemsize

    # Lane-dense feature axis: pad dim to a multiple of 128.
    dim_p = pl.cdiv(dim, 128) * 128

    # Row tile sized from a VMEM budget:
    #   2 double-buffered input tiles + 2 output tiles + ~2x f32 intermediates.
    row_multiple = max(8, 32 // in_bytes)                   # 8 f32, 16 bf16, 32 int8
    vmem_budget = 24 * 1024 * 1024
    bytes_per_row = dim_p * (2 * in_bytes + 2 * out_bytes + 8)
    block_rows = vmem_budget // bytes_per_row
    block_rows = max(row_multiple, (block_rows // row_multiple) * row_multiple)
    block_rows = min(block_rows, 2048)
    rows_min_padded = pl.cdiv(rows, row_multiple) * row_multiple
    block_rows = min(block_rows, rows_min_padded)

    rows_p = pl.cdiv(rows, block_rows) * block_rows

    # Pad rows / dim with zeros (zero rows normalize to zero; zero cols drop out).
    if rows_p != rows or dim_p != dim:
        x2 = jnp.pad(x2, ((0, rows_p - rows), (0, dim_p - dim)))
    w2d = jnp.pad(weight, (0, dim_p - dim)).reshape(1, dim_p).astype(out_dtype)

    kernel = functools.partial(_rmsnorm_kernel, eps=float(norm_eps), inv_dim=1.0 / dim)

    out = pl.pallas_call(
        kernel,
        out_shape=jax.ShapeDtypeStruct((rows_p, dim_p), out_dtype),
        grid_spec=pltpu.PrefetchScalarGridSpec(
            num_scalar_prefetch=0,
            grid=(rows_p // block_rows,),
            in_specs=[
                pl.BlockSpec((block_rows, dim_p), lambda i: (i, 0)),
                pl.BlockSpec((1, dim_p), lambda i: (0, 0)),   # resident weight
            ],
            out_specs=pl.BlockSpec((block_rows, dim_p), lambda i: (i, 0)),
        ),
        compiler_params=pltpu.CompilerParams(
            dimension_semantics=("parallel",),
            # Raised above every generation's scoped default, under v7x's 64 MiB.
            vmem_limit_bytes=40 * 1024 * 1024,
        ),
    )(x2, w2d)

    if rows_p != rows or dim_p != dim:
        out = out[:rows, :dim]
    return out.reshape(orig_shape[:-1] + (dim,))


def rmsnorm_ref(x, weight, norm_eps):
    x32 = x.astype(jnp.float32)
    ms = jnp.mean(x32 * x32, axis=-1, keepdims=True)
    normed = (x32 * jnp.sqrt(ms + norm_eps)).astype(x.dtype)
    return normed * weight.reshape(1, -1)


if __name__ == "__main__":
    key = jax.random.PRNGKey(0)
    batch, seq, dim = 2, 8, 32
    norm_eps = 1e-5

    x = jax.random.normal(key, (batch, seq, dim), dtype=jnp.float32)
    # Deterministic parameter init (module initializes weight to ones).
    weight = jnp.ones((dim,), dtype=jnp.float32)

    out = rmsnorm(x, weight, norm_eps)
    out = jax.block_until_ready(out)

    ref = rmsnorm_ref(x.reshape(-1, dim), weight, norm_eps).reshape(batch, seq, dim)
    assert out.shape == ref.shape and out.dtype == ref.dtype
    assert jnp.allclose(out, ref, atol=1e-5, rtol=1e-5)

    print("KERNEL_OK")
</pallas_src>

<mosaic_0001>
module attributes {stable_mosaic.version = 11 : i64} {
  func.func @_rmsnorm_kernel(%arg0: i32, %arg1: memref<16x128xf32, #tpu.memory_space<vmem>>, %arg2: memref<1x128xf32, #tpu.memory_space<vmem>>, %arg3: memref<16x128xf32, #tpu.memory_space<vmem>>) attributes {dimension_semantics = [#tpu.dimension_semantics<parallel>], iteration_bounds = array<i64: 1>, scalar_prefetch = 0 : i64, scratch_operands = 0 : i64, tpu.core_type = #tpu.core_type<tc>, window_params = [{transform_indices = @transform_0, window_bounds = array<i64: 16, 128>}, {pipeline_mode = #tpu.pipeline_mode<synchronous>, transform_indices = @transform_1, window_bounds = array<i64: 1, 128>}, {transform_indices = @transform_2, window_bounds = array<i64: 16, 128>}]} {
    %c0 = arith.constant 0 : index
    %c0_0 = arith.constant 0 : index
    %0 = vector.load %arg1[%c0, %c0_0] : memref<16x128xf32, #tpu.memory_space<vmem>>, vector<16x128xf32>
    %1 = arith.mulf %0, %0 : vector<16x128xf32>
    %cst = arith.constant dense<0.000000e+00> : vector<16xf32>
    %2 = vector.multi_reduction <add>, %1, %cst [1] : vector<16x128xf32> to vector<16xf32>
    %3 = vector.shape_cast %2 : vector<16xf32> to vector<16x1xf32>
    %cst_1 = arith.constant 3.125000e-02 : f32
    %4 = vector.broadcast %cst_1 : f32 to vector<16x1xf32>
    %5 = arith.mulf %3, %4 : vector<16x1xf32>
    %cst_2 = arith.constant 9.99999974E-6 : f32
    %6 = vector.broadcast %cst_2 : f32 to vector<16x1xf32>
    %7 = arith.addf %5, %6 : vector<16x1xf32>
    %8 = math.sqrt %7 : vector<16x1xf32>
    %9 = vector.broadcast %8 : vector<16x1xf32> to vector<16x128xf32>
    %10 = arith.mulf %0, %9 : vector<16x128xf32>
    %c0_3 = arith.constant 0 : index
    %c0_4 = arith.constant 0 : index
    %11 = vector.load %arg2[%c0_3, %c0_4] : memref<1x128xf32, #tpu.memory_space<vmem>>, vector<1x128xf32>
    %12 = vector.broadcast %11 : vector<1x128xf32> to vector<16x128xf32>
    %13 = arith.mulf %10, %12 : vector<16x128xf32>
    %c0_5 = arith.constant 0 : index
    %c0_6 = arith.constant 0 : index
    %14 = vector.load %arg3[%c0_5, %c0_6] : memref<16x128xf32, #tpu.memory_space<vmem>>, vector<16x128xf32>
    tpu.vector_store %arg3[%c0_5, %c0_6], %13 {strides = array<i32>} : memref<16x128xf32, #tpu.memory_space<vmem>>, vector<16x128xf32>,
    return
  }
  func.func @transform_0(%arg0: i32) -> (i32, i32) {
    %c0_i32 = arith.constant 0 : i32
    %c0_i32_0 = arith.constant 0 : i32
    return %arg0, %c0_i32 : i32, i32
  }
  func.func @transform_1(%arg0: i32) -> (i32, i32) {
    %c0_i32 = arith.constant 0 : i32
    %c0_i32_0 = arith.constant 0 : i32
    %c0_i32_1 = arith.constant 0 : i32
    return %c0_i32, %c0_i32_0 : i32, i32
  }
  func.func @transform_2(%arg0: i32) -> (i32, i32) {
    %c0_i32 = arith.constant 0 : i32
    %c0_i32_0 = arith.constant 0 : i32
    return %arg0, %c0_i32 : i32, i32
  }
}

</mosaic_0001>

<bundles_post_ra>
// kernel: tpu_custom_call.1
= control target key start
LH: loop header
LB: loop body
LE: loop exit
PB: predicated region body
PF: predicated region fallthrough
CT: control target
= control target key end

     0   :  { %7 = vsyncpa [#allocation3], 0  ;;  %s169_s0 = inlined_call_operand.hbm [shape: f32[16,128], index: 0, kind: input, shape index: {}]   ;;  %s170_s1 = inlined_call_operand.vmem [shape: f32[1,128], index: 1, kind: input, shape index: {}]   ;;  %s171_s2 = inlined_call_operand.hbm [shape: f32[16,128], index: 2, kind: output, shape index: {}]  }
   0x1   :  { %8 = vsyncpa [#allocation4], 0  ;;  %s135_s9 = smov [#allocation2]  }
   0x2   :  { %s14_s10 = sshll.u32 %s135_s9, 4  ;;  %s15_s10 = int_to_ptr.vmem [resolvable:$true] %s14_s10 }
   0x3   :  { %s99_s11 = scalar_lea.vmem %s15_s10, 256  ;;  %p104_p1 = scmp.lt.s32.totalorder %s15_s10, %s15_s10 }
   0x4   :  { %p100_p0 = scmp.ne.s32.totalorder %s15_s10, %s99_s11  ;;  %p105_p2 = scmp.lt.s32.totalorder %s99_s11, %s99_s11 }
   0x6   :  { %p106_p3 = por %p105_p2, %p104_p1 }
   0x8   :  { %p107_p4 = pnand %p106_p3, %p100_p0 }
   0xa   :  { %110 = shalt.err (!%p107_p4)
}
   0xb   :  { %s136_s12 = smov 128   ;;  %s137_s13 = smov 8  }
   0xc   :  { %20 = dma.hbm_to_vmem [thread:$0]  %s169_s0, 256, %s15_s10, [#allocation3], %s136_s12, %s136_s12, %s137_s13  }
   0xd   :  { %131 = dma.done.wait [#allocation3], 256  }
   0xe   :  { %132 = vsyncadd [#allocation3], 4294967040  ;;  %v26_v0 = vld [vmem:[#allocation2] sm:$0xff]  ;;  %v27_v1 = vld [vmem:[#allocation2 + $0x8] sm:$0xff]  ;;  %s138_s17 = smov [#allocation5]  }
   0xf   :  { %v28_v2 = vmul.f32 %v26_v0, %v26_v0  ;;  %v29_v3 = vmul.f32 %v27_v1, %v27_v1  ;;  %v82_v16 = vld [vmem:[%s170_s1] ss:$0 sm:$0xff]  ;;  %s70_s18 = sshll.u32 %s138_s17, 4  ;;  %s71_s18 = int_to_ptr.vmem [resolvable:$true] %s70_s18 }
  0x10   :  { %s111_s19 = scalar_lea.vmem %s71_s18, 256  ;;  %p116_p6 = scmp.lt.s32.totalorder %s71_s18, %s71_s18 }
  0x11   :  { %30 = vadd.xlane.f32.xlu0 %v28_v2  ;;  %p112_p5 = scmp.ne.s32.totalorder %s71_s18, %s111_s19  ;;  %p117_p7 = scmp.lt.s32.totalorder %s111_s19, %s111_s19 }
  0x13   :  { %p118_p8 = por %p117_p7, %p116_p6 }
  0x15   :  { %32 = vadd.xlane.f32.xlu0 %v29_v3  ;;  %p119_p9 = pnand %p118_p8, %p112_p5 }
  0x9a   :  { %v31_v4 = vpop.xlane.xlu0 %30 }
  0x9b   :  { %v34_v5 = vmul.f32 0.03125, %v31_v4 }
  0x9d   :  { %v36_v6 = vadd.f32 1e-05, %v34_v5 }
  0x9e   :  { %v33_v7 = vpop.xlane.xlu0 %32 }
  0x9f   :  { %87 = vrsqrt.f32 %v36_v6  ;;  %v35_v8 = vmul.f32 0.03125, %v33_v7  ;;  %vm40_vm0 = vcmp.eq.f32.partialorder %v36_v6, inf  ;;  %v43_v12 = vand.u32 2147483648, %v36_v6 }
  0xa0   :  { %vm42_vm1 = vcmp.eq.f32.partialorder %v36_v6, 0.0 }
  0xa1   :  { %v37_v9 = vadd.f32 1e-05, %v35_v8 }
  0xa3   :  { %89 = vrsqrt.f32 %v37_v9  ;;  %vm47_vm2 = vcmp.eq.f32.partialorder %v37_v9, inf  ;;  %v50_v19 = vand.u32 2147483648, %v37_v9  ;;  %vm49_vm3 = vcmp.eq.f32.partialorder %v37_v9, 0.0 }
  0xac   :  { %v88_v10 = vpop.eup %87 }
  0xad   :  { %v39_v11 = vmul.f32 %v88_v10, %v36_v6 }
  0xaf   :  { %v41_v13 = vsel %vm40_vm0, %v36_v6, %v39_v11 }
  0xb0   :  { %v90_v14 = vpop.eup %89  ;;  %v44_v15 = vsel %vm42_vm1, %v43_v12, %v41_v13 }
  0xb1   :  { %v46_v17 = vmul.f32 %v90_v14, %v37_v9  ;;  %v52_v18 = vmul.f32 %v44_v15, %v26_v0 }
  0xb3   :  { %v48_v20 = vsel %vm47_vm2, %v37_v9, %v46_v17  ;;  %v61_v21 = vmul.f32 %v82_v16, %v52_v18 }
  0xb4   :  { %v51_v22 = vsel %vm49_vm3, %v50_v19, %v48_v20 }
  0xb5   :  { %v53_v23 = vmul.f32 %v51_v22, %v27_v1  ;;  %63 = vst [vmem:[#allocation5] sm:$0xff] %v61_v21 }
  0xb7   :  { %v62_v24 = vmul.f32 %v82_v16, %v53_v23 }
  0xb9   :  { %64 = vst [vmem:[#allocation5 + $0x8] sm:$0xff] %v62_v24 }
  0xba   :  { %122 = shalt.err (!%p119_p9)
}
  0xbb   :  { %76 = dma.vmem_to_hbm [thread:$0]  %s71_s18, 256, %s171_s2, [#allocation4], %s136_s12, %s136_s12, %s137_s13  }
  0xbc   :  { %133 = dma.done.wait [#allocation4], 256  }
  0xbd   :  { %134 = vsyncadd [#allocation4], 4294967040 }
  0xbe   :  { %80 = vsyncpa [#allocation3], 1 }
  0xbf   :  { %81 = vsyncpa [#allocation4], 1 }

</bundles_post_ra>
